<compile_context>
chip_gen: v6e
topology: v6e:2x2x1
jax: 0.10.0
libtpu: 0.0.40
codegen_flags: <defaults>
</compile_context>

<pallas_src>
import jax
import jax.numpy as jnp
from jax.experimental import pallas as pl
from jax.experimental.pallas import tpu as pltpu

_LANE = 128
_SUBLANE = 8
_MIB = 1 << 20


def _round_up(x, m):
    return ((x + m - 1) // m) * m


def _cdiv(a, b):
    return -(-a // b)


def _tpu_kind():
    try:
        dev = jax.devices()[0]
        if dev.platform == "tpu":
            return dev.device_kind.lower()
    except Exception:
        pass
    return ""


def _make_fused_mlp_kernel(num_layers, bf16_epilogue):
    """Fused MLP kernel.  Ref layout: x_ref, w0, b0, w1, b1, ..., o_ref."""

    def kernel(x_ref, *refs):
        o_ref = refs[2 * num_layers]
        # Activation stream arrives as bf16 (padded path) or f32 (aligned
        # passthrough); the cast is a no-op when already bf16.
        h = x_ref[...].astype(jnp.bfloat16)
        for l in range(num_layers):          # statically unrolled at trace time
            w_ref = refs[2 * l]              # (in_pad, out_pad) bf16, VMEM-resident
            b_ref = refs[2 * l + 1]          # (1, out_pad), VMEM-resident
            # bf16 operands -> full-rate MXU; f32 accumulation.
            y = jnp.dot(h, w_ref[...], preferred_element_type=jnp.float32)
            if bf16_epilogue:
                # v6e/v7x: bf16 VPU/EUP path; h stays bf16 into the next matmul.
                h = jnp.tanh(y.astype(jnp.bfloat16) + b_ref[...])
            else:
                # v5e: f32-only EUP; keep epilogue f32, recast for next MXU op.
                h = jnp.tanh(y + b_ref[...]).astype(jnp.bfloat16)
        o_ref[...] = h.astype(o_ref.dtype)

    return kernel


class Encoder:
    """JAX/Pallas port of the PyTorch Encoder:
    [Linear(in,h0), Tanh, ..., Linear(h_last, code_size), Tanh]."""

    def __init__(self, input_size, code_size, hidden_sizes=(), *, key, tile_m=None):
        self.input_size = int(input_size)
        self.code_size = int(code_size)

        kind = _tpu_kind()
        self._is_v5e = ("v5 lite" in kind) or ("v5e" in kind) or ("v5lite" in kind)
        self._is_v7 = "v7" in kind
        # bf16 bias+tanh epilogue only on chips with a bf16 VPU/EUP path.
        self._bf16_epilogue = not self._is_v5e

        if tile_m is None:
            tile_m = 256 if self._is_v7 else 512   # v7x: 64 MiB VMEM -> smaller tile
        # Batch tile must be a multiple of the 8-row sublane granule.
        self.tile_m = max(_SUBLANE, (int(tile_m) // _SUBLANE) * _SUBLANE)

        bias_dtype = jnp.bfloat16 if self._bf16_epilogue else jnp.float32
        layer_sizes = list(hidden_sizes) + [code_size]
        self.params = []         # unpadded f32 (w, b) — reference / export
        self.padded_params = []  # (w_pad bf16 [in_pad,out_pad], b_pad [1,out_pad])

        prev = self.input_size
        for layer_size in layer_sizes:
            key, kw, kb = jax.random.split(key, 3)
            # torch.nn.Linear default init: U(-1/sqrt(fan_in), 1/sqrt(fan_in)).
            bound = 1.0 / float(prev) ** 0.5
            w = jax.random.uniform(kw, (prev, layer_size), jnp.float32, -bound, bound)
            b = jax.random.uniform(kb, (layer_size,), jnp.float32, -bound, bound)
            self.params.append((w, b))

            in_pad = _round_up(prev, _LANE)
            out_pad = _round_up(layer_size, _LANE)
            w_pad = (jnp.zeros((in_pad, out_pad), jnp.float32)
                     .at[:prev, :layer_size].set(w)
                     .astype(jnp.bfloat16))
            b_pad = (jnp.zeros((1, out_pad), jnp.float32)
                     .at[0, :layer_size].set(b)
                     .astype(bias_dtype))
            self.padded_params.append((w_pad, b_pad))
            prev = layer_size

        self._in_pad = self.padded_params[0][0].shape[0]
        self._code_pad = self.padded_params[-1][0].shape[1]
        self._max_out_pad = max(w.shape[1] for w, _ in self.padded_params)
        self._num_layers = len(self.padded_params)
        self._weight_bytes = sum(
            w.size * w.dtype.itemsize + b.size * b.dtype.itemsize
            for w, b in self.padded_params)

    # ------------------------------------------------------------------ call
    def __call__(self, x):
        B, F = x.shape
        assert F == self.input_size

        # Balanced batch tiling (avoids up-to-2x ragged padding waste).
        num_tiles = _cdiv(B, self.tile_m)
        if self._is_v7 and num_tiles == 1 and B > _SUBLANE:
            num_tiles = 2            # give both v7x TensorCores a grid step
        tm = _round_up(_cdiv(B, num_tiles), _SUBLANE)
        b_pad = num_tiles * tm

        if B == b_pad and F == self._in_pad:
            x_in = x                 # already aligned: no wrapper pad/copy
        else:
            # Fused zero-pad + bf16 cast: grid-varying stream at half the bytes.
            x_in = (jnp.zeros((b_pad, self._in_pad), jnp.bfloat16)
                    .at[:B, :F].set(x.astype(jnp.bfloat16)))

        try:
            out = self._invoke(x_in, tm, num_tiles, single_buffer_weights=True)
        except Exception:
            # Fallback if pl.Buffered(1) is unsupported by the installed jax:
            # default double-buffering is correct, just uses more VMEM.
            out = self._invoke(x_in, tm, num_tiles, single_buffer_weights=False)

        if B == b_pad and self.code_size == self._code_pad:
            return out
        return out[:B, :self.code_size]

    # ------------------------------------------------------------ pallas call
    def _invoke(self, x_in, tm, num_tiles, *, single_buffer_weights):
        b_pad = num_tiles * tm

        in_specs = [pl.BlockSpec((tm, self._in_pad), lambda i: (i, 0))]
        const_kw = ({"pipeline_mode": pl.Buffered(1)}
                    if single_buffer_weights else {})
        flat_params = []
        for w_p, b_p in self.padded_params:
            # Constant index_map: weights/biases fetched once, VMEM-resident.
            in_specs.append(pl.BlockSpec(w_p.shape, lambda i: (0, 0), **const_kw))
            in_specs.append(pl.BlockSpec(b_p.shape, lambda i: (0, 0), **const_kw))
            flat_params.append(w_p)
            flat_params.append(b_p)

        # Explicit VMEM budget: resident weights + double-buffered activation
        # in/out tiles + headroom for the widest (tm, out_pad) intermediate.
        wbuf = 1 if single_buffer_weights else 2
        act_bytes = (2 * tm * self._in_pad * x_in.dtype.itemsize
                     + 2 * tm * self._code_pad * 4)
        scratch_bytes = 4 * tm * self._max_out_pad * 4
        needed = wbuf * self._weight_bytes + act_bytes + scratch_bytes
        cap = (48 * _MIB) if self._is_v7 else (100 * _MIB)
        vmem_limit = int(min(max(needed * 5 // 4, 32 * _MIB), cap))

        return pl.pallas_call(
            _make_fused_mlp_kernel(self._num_layers, self._bf16_epilogue),
            out_shape=jax.ShapeDtypeStruct((b_pad, self._code_pad), jnp.float32),
            grid=(num_tiles,),
            in_specs=in_specs,
            out_specs=pl.BlockSpec((tm, self._code_pad), lambda i: (i, 0)),
            compiler_params=pltpu.CompilerParams(
                dimension_semantics=("parallel",),
                vmem_limit_bytes=vmem_limit),
        )(x_in, *flat_params)


def _reference_forward(params, x):
    # Pure-JAX f32 reference for correctness checking.
    for w, b in params:
        x = jnp.tanh(x @ w + b[None, :])
    return x


if __name__ == "__main__":
    key = jax.random.PRNGKey(0)
    k_in, k_model = jax.random.split(key)

    batch = 8
    input_size = 16
    hidden_sizes = [32]
    code_size = 8

    x = jax.random.normal(k_in, (batch, input_size), jnp.float32)

    enc = Encoder(input_size, code_size, hidden_sizes, key=k_model)

    out = jax.block_until_ready(enc(x))
    ref = _reference_forward(enc.params, x)

    assert out.shape == (batch, code_size)
    # bf16 matmul operands (and bf16 epilogue on v6e/v7x) vs f32 reference.
    max_err = float(jnp.max(jnp.abs(out - ref)))
    assert jnp.allclose(out, ref, atol=3e-2, rtol=3e-2), f"max abs err = {max_err}"

    print("KERNEL_OK")
</pallas_src>

<mosaic_0001>
module attributes {stable_mosaic.version = 11 : i64} {
  func.func @kernel(%arg0: i32, %arg1: memref<8x128xbf16, #tpu.memory_space<vmem>>, %arg2: memref<128x128xbf16, #tpu.memory_space<vmem>>, %arg3: memref<1x128xbf16, #tpu.memory_space<vmem>>, %arg4: memref<128x128xbf16, #tpu.memory_space<vmem>>, %arg5: memref<1x128xbf16, #tpu.memory_space<vmem>>, %arg6: memref<8x128xf32, #tpu.memory_space<vmem>>) attributes {dimension_semantics = [#tpu.dimension_semantics<parallel>], iteration_bounds = array<i64: 1>, scalar_prefetch = 0 : i64, scratch_operands = 0 : i64, tpu.core_type = #tpu.core_type<tc>, window_params = [{transform_indices = @transform_0, window_bounds = array<i64: 8, 128>}, {pipeline_mode = #tpu.pipeline_mode<synchronous>, transform_indices = @transform_1, window_bounds = array<i64: 128, 128>}, {pipeline_mode = #tpu.pipeline_mode<synchronous>, transform_indices = @transform_2, window_bounds = array<i64: 1, 128>}, {pipeline_mode = #tpu.pipeline_mode<synchronous>, transform_indices = @transform_3, window_bounds = array<i64: 128, 128>}, {pipeline_mode = #tpu.pipeline_mode<synchronous>, transform_indices = @transform_4, window_bounds = array<i64: 1, 128>}, {transform_indices = @transform_5, window_bounds = array<i64: 8, 128>}]} {
    %c0 = arith.constant 0 : index
    %c0_0 = arith.constant 0 : index
    %0 = vector.load %arg1[%c0, %c0_0] : memref<8x128xbf16, #tpu.memory_space<vmem>>, vector<8x128xbf16>
    %c0_1 = arith.constant 0 : index
    %c0_2 = arith.constant 0 : index
    %1 = vector.load %arg2[%c0_1, %c0_2] : memref<128x128xbf16, #tpu.memory_space<vmem>>, vector<128x128xbf16>
    %cst = arith.constant dense<0.000000e+00> : vector<8x128xf32>
    %2 = tpu.matmul %0, %1, %cst {dimension_numbers = #tpu.dot_dimension_numbers<[1], [0], [0], [1], [0, 0, 1, 1], [], []>} : vector<8x128xbf16>, vector<128x128xbf16>, vector<8x128xf32> -> vector<8x128xf32>
    %3 = arith.truncf %2 : vector<8x128xf32> to vector<8x128xbf16>
    %c0_3 = arith.constant 0 : index
    %c0_4 = arith.constant 0 : index
    %4 = vector.load %arg3[%c0_3, %c0_4] : memref<1x128xbf16, #tpu.memory_space<vmem>>, vector<1x128xbf16>
    %5 = vector.broadcast %4 : vector<1x128xbf16> to vector<8x128xbf16>
    %6 = arith.addf %3, %5 : vector<8x128xbf16>
    %7 = math.tanh %6 : vector<8x128xbf16>
    %c0_5 = arith.constant 0 : index
    %c0_6 = arith.constant 0 : index
    %8 = vector.load %arg4[%c0_5, %c0_6] : memref<128x128xbf16, #tpu.memory_space<vmem>>, vector<128x128xbf16>
    %cst_7 = arith.constant dense<0.000000e+00> : vector<8x128xf32>
    %9 = tpu.matmul %7, %8, %cst_7 {dimension_numbers = #tpu.dot_dimension_numbers<[1], [0], [0], [1], [0, 0, 1, 1], [], []>} : vector<8x128xbf16>, vector<128x128xbf16>, vector<8x128xf32> -> vector<8x128xf32>
    %10 = arith.truncf %9 : vector<8x128xf32> to vector<8x128xbf16>
    %c0_8 = arith.constant 0 : index
    %c0_9 = arith.constant 0 : index
    %11 = vector.load %arg5[%c0_8, %c0_9] : memref<1x128xbf16, #tpu.memory_space<vmem>>, vector<1x128xbf16>
    %12 = vector.broadcast %11 : vector<1x128xbf16> to vector<8x128xbf16>
    %13 = arith.addf %10, %12 : vector<8x128xbf16>
    %14 = math.tanh %13 : vector<8x128xbf16>
    %15 = arith.extf %14 : vector<8x128xbf16> to vector<8x128xf32>
    %c0_10 = arith.constant 0 : index
    %c0_11 = arith.constant 0 : index
    %16 = vector.load %arg6[%c0_10, %c0_11] : memref<8x128xf32, #tpu.memory_space<vmem>>, vector<8x128xf32>
    tpu.vector_store %arg6[%c0_10, %c0_11], %15 {strides = array<i32>} : memref<8x128xf32, #tpu.memory_space<vmem>>, vector<8x128xf32>,
    return
  }
  func.func @transform_0(%arg0: i32) -> (i32, i32) {
    %c0_i32 = arith.constant 0 : i32
    %c0_i32_0 = arith.constant 0 : i32
    return %arg0, %c0_i32 : i32, i32
  }
  func.func @transform_1(%arg0: i32) -> (i32, i32) {
    %c0_i32 = arith.constant 0 : i32
    %c0_i32_0 = arith.constant 0 : i32
    %c0_i32_1 = arith.constant 0 : i32
    return %c0_i32, %c0_i32_0 : i32, i32
  }
  func.func @transform_2(%arg0: i32) -> (i32, i32) {
    %c0_i32 = arith.constant 0 : i32
    %c0_i32_0 = arith.constant 0 : i32
    %c0_i32_1 = arith.constant 0 : i32
    return %c0_i32, %c0_i32_0 : i32, i32
  }
  func.func @transform_3(%arg0: i32) -> (i32, i32) {
    %c0_i32 = arith.constant 0 : i32
    %c0_i32_0 = arith.constant 0 : i32
    %c0_i32_1 = arith.constant 0 : i32
    return %c0_i32, %c0_i32_0 : i32, i32
  }
  func.func @transform_4(%arg0: i32) -> (i32, i32) {
    %c0_i32 = arith.constant 0 : i32
    %c0_i32_0 = arith.constant 0 : i32
    %c0_i32_1 = arith.constant 0 : i32
    return %c0_i32, %c0_i32_0 : i32, i32
  }
  func.func @transform_5(%arg0: i32) -> (i32, i32) {
    %c0_i32 = arith.constant 0 : i32
    %c0_i32_0 = arith.constant 0 : i32
    return %arg0, %c0_i32 : i32, i32
  }
}

module attributes {stable_mosaic.version = 11 : i64} {
  func.func @kernel(%arg0: i32, %arg1: memref<8x128xbf16, #tpu.memory_space<vmem>>, %arg2: memref<128x128xbf16, #tpu.memory_space<vmem>>, %arg3: memref<1x128xbf16, #tpu.memory_space<vmem>>, %arg4: memref<128x128xbf16, #tpu.memory_space<vmem>>, %arg5: memref<1x128xbf16, #tpu.memory_space<vmem>>, %arg6: memref<8x128xf32, #tpu.memory_space<vmem>>) attributes {dimension_semantics = [#tpu.dimension_semantics<parallel>], iteration_bounds = array<i64: 1>, scalar_prefetch = 0 : i64, scratch_operands = 0 : i64, tpu.core_type = #tpu.core_type<tc>, window_params = [{transform_indices = @transform_0, window_bounds = array<i64: 8, 128>}, {pipeline_mode = #tpu.pipeline_mode<synchronous>, transform_indices = @transform_1, window_bounds = array<i64: 128, 128>}, {pipeline_mode = #tpu.pipeline_mode<synchronous>, transform_indices = @transform_2, window_bounds = array<i64: 1, 128>}, {pipeline_mode = #tpu.pipeline_mode<synchronous>, transform_indices = @transform_3, window_bounds = array<i64: 128, 128>}, {pipeline_mode = #tpu.pipeline_mode<synchronous>, transform_indices = @transform_4, window_bounds = array<i64: 1, 128>}, {transform_indices = @transform_5, window_bounds = array<i64: 8, 128>}]} {
    %c0 = arith.constant 0 : index
    %c0_0 = arith.constant 0 : index
    %0 = vector.load %arg1[%c0, %c0_0] : memref<8x128xbf16, #tpu.memory_space<vmem>>, vector<8x128xbf16>
    %c0_1 = arith.constant 0 : index
    %c0_2 = arith.constant 0 : index
    %1 = vector.load %arg2[%c0_1, %c0_2] : memref<128x128xbf16, #tpu.memory_space<vmem>>, vector<128x128xbf16>
    %cst = arith.constant dense<0.000000e+00> : vector<8x128xf32>
    %2 = tpu.matmul %0, %1, %cst {dimension_numbers = #tpu.dot_dimension_numbers<[1], [0], [0], [1], [0, 0, 1, 1], [], []>} : vector<8x128xbf16>, vector<128x128xbf16>, vector<8x128xf32> -> vector<8x128xf32>
    %3 = arith.truncf %2 : vector<8x128xf32> to vector<8x128xbf16>
    %c0_3 = arith.constant 0 : index
    %c0_4 = arith.constant 0 : index
    %4 = vector.load %arg3[%c0_3, %c0_4] : memref<1x128xbf16, #tpu.memory_space<vmem>>, vector<1x128xbf16>
    %5 = vector.broadcast %4 : vector<1x128xbf16> to vector<8x128xbf16>
    %6 = arith.addf %3, %5 : vector<8x128xbf16>
    %7 = math.tanh %6 : vector<8x128xbf16>
    %c0_5 = arith.constant 0 : index
    %c0_6 = arith.constant 0 : index
    %8 = vector.load %arg4[%c0_5, %c0_6] : memref<128x128xbf16, #tpu.memory_space<vmem>>, vector<128x128xbf16>
    %cst_7 = arith.constant dense<0.000000e+00> : vector<8x128xf32>
    %9 = tpu.matmul %7, %8, %cst_7 {dimension_numbers = #tpu.dot_dimension_numbers<[1], [0], [0], [1], [0, 0, 1, 1], [], []>} : vector<8x128xbf16>, vector<128x128xbf16>, vector<8x128xf32> -> vector<8x128xf32>
    %10 = arith.truncf %9 : vector<8x128xf32> to vector<8x128xbf16>
    %c0_8 = arith.constant 0 : index
    %c0_9 = arith.constant 0 : index
    %11 = vector.load %arg5[%c0_8, %c0_9] : memref<1x128xbf16, #tpu.memory_space<vmem>>, vector<1x128xbf16>
    %12 = vector.broadcast %11 : vector<1x128xbf16> to vector<8x128xbf16>
    %13 = arith.addf %10, %12 : vector<8x128xbf16>
    %14 = math.tanh %13 : vector<8x128xbf16>
    %15 = arith.extf %14 : vector<8x128xbf16> to vector<8x128xf32>
    %c0_10 = arith.constant 0 : index
    %c0_11 = arith.constant 0 : index
    %16 = vector.load %arg6[%c0_10, %c0_11] : memref<8x128xf32, #tpu.memory_space<vmem>>, vector<8x128xf32>
    tpu.vector_store %arg6[%c0_10, %c0_11], %15 {strides = array<i32>} : memref<8x128xf32, #tpu.memory_space<vmem>>, vector<8x128xf32>,
    return
  }
  func.func @transform_0(%arg0: i32) -> (i32, i32) {
    %c0_i32 = arith.constant 0 : i32
    %c0_i32_0 = arith.constant 0 : i32
    return %arg0, %c0_i32 : i32, i32
  }
  func.func @transform_1(%arg0: i32) -> (i32, i32) {
    %c0_i32 = arith.constant 0 : i32
    %c0_i32_0 = arith.constant 0 : i32
    %c0_i32_1 = arith.constant 0 : i32
    return %c0_i32, %c0_i32_0 : i32, i32
  }
  func.func @transform_2(%arg0: i32) -> (i32, i32) {
    %c0_i32 = arith.constant 0 : i32
    %c0_i32_0 = arith.constant 0 : i32
    %c0_i32_1 = arith.constant 0 : i32
    return %c0_i32, %c0_i32_0 : i32, i32
  }
  func.func @transform_3(%arg0: i32) -> (i32, i32) {
    %c0_i32 = arith.constant 0 : i32
    %c0_i32_0 = arith.constant 0 : i32
    %c0_i32_1 = arith.constant 0 : i32
    return %c0_i32, %c0_i32_0 : i32, i32
  }
  func.func @transform_4(%arg0: i32) -> (i32, i32) {
    %c0_i32 = arith.constant 0 : i32
    %c0_i32_0 = arith.constant 0 : i32
    %c0_i32_1 = arith.constant 0 : i32
    return %c0_i32, %c0_i32_0 : i32, i32
  }
  func.func @transform_5(%arg0: i32) -> (i32, i32) {
    %c0_i32 = arith.constant 0 : i32
    %c0_i32_0 = arith.constant 0 : i32
    return %arg0, %c0_i32 : i32, i32
  }
}

</mosaic_0001>

<bundles_post_ra>
// kernel: tpu_custom_call.1
= control target key start
LH: loop header
LB: loop body
LE: loop exit
PB: predicated region body
PF: predicated region fallthrough
CT: control target
= control target key end

     0   :  { %10 = vsyncpa [#allocation3], 0  ;;  %s554_s0 = inlined_call_operand.hbm [shape: bf16[8,128], index: 0, kind: input, shape index: {}]   ;;  %s555_s1 = inlined_call_operand.hbm [shape: bf16[128,128], index: 1, kind: input, shape index: {}]   ;;  %s556_s2 = inlined_call_operand.vmem [shape: bf16[1,128], index: 2, kind: input, shape index: {}]   ;;  %s557_s3 = inlined_call_operand.hbm [shape: bf16[128,128], index: 3, kind: input, shape index: {}]   ;;  %s558_s4 = inlined_call_operand.vmem [shape: bf16[1,128], index: 4, kind: input, shape index: {}]   ;;  %s559_s5 = inlined_call_operand.hbm [shape: f32[8,128], index: 5, kind: output, shape index: {}]  }
   0x1   :  { %11 = vsyncpa [#allocation6], 0 }
   0x2   :  { %12 = vsyncpa [#allocation4], 0  ;;  %s498_s18 = smov [#allocation5]  }
   0x3   :  { %s28_s19 = sshll.u32 %s498_s18, 4  ;;  %s29_s19 = int_to_ptr.vmem [resolvable:$true] %s28_s19 }
   0x4   :  { %s420_s20 = scalar_lea.vmem %s29_s19, 1024  ;;  %p425_p1 = scmp.lt.s32.totalorder %s29_s19, %s29_s19 }
   0x5   :  { %p421_p0 = scmp.ne.s32.totalorder %s29_s19, %s420_s20  ;;  %p426_p2 = scmp.lt.s32.totalorder %s420_s20, %s420_s20 }
   0x7   :  { %p427_p3 = por %p426_p2, %p425_p1 }
   0x9   :  { %p428_p4 = pnand %p427_p3, %p421_p0 }
   0xb   :  { %431 = shalt.err (!%p428_p4)
}
   0xc   :  { %s499_s21 = smov 64   ;;  %s500_s22 = smov 4  }
   0xd   :  { %34 = dma.hbm_to_vmem [thread:$0]  %s555_s1, 1024, %s29_s19, [#allocation6], %s499_s21, %s499_s21, %s500_s22  }
   0xe   :  { %s501_s25 = smov [#allocation2]   ;;  %s502_s27 = smov [#allocation7]  }
   0xf   :  { %s19_s26 = sshll.u32 %s501_s25, 4  ;;  %s42_s28 = sshll.u32 %s502_s27, 4  ;;  %s20_s26 = int_to_ptr.vmem [resolvable:$true] %s19_s26  ;;  %s43_s28 = int_to_ptr.vmem [resolvable:$true] %s42_s28 }
  0x10   :  { %s440_s29 = scalar_lea.vmem %s20_s26, 64  ;;  %p445_p6 = scmp.lt.s32.totalorder %s20_s26, %s20_s26 }
  0x11   :  { %p441_p5 = scmp.ne.s32.totalorder %s20_s26, %s440_s29  ;;  %p446_p7 = scmp.lt.s32.totalorder %s440_s29, %s440_s29 }
  0x13   :  { %p447_p8 = por %p446_p7, %p445_p6 }
  0x15   :  { %p448_p9 = pnand %p447_p8, %p441_p5 }
  0x17   :  { %451 = shalt.err (!%p448_p9)
}
  0x18   :  { %22 = dma.hbm_to_vmem [thread:$0]  %s554_s0, 64, %s20_s26, [#allocation3]  }
  0x19   :  { %s460_s7 = scalar_lea.vmem %s43_s28, 1024  ;;  %p465_p11 = scmp.lt.s32.totalorder %s43_s28, %s43_s28 }
  0x1a   :  { %p461_p10 = scmp.ne.s32.totalorder %s43_s28, %s460_s7  ;;  %p466_p12 = scmp.lt.s32.totalorder %s460_s7, %s460_s7 }
  0x1c   :  { %p467_p13 = por %p466_p12, %p465_p11 }
  0x1e   :  { %p468_p0 = pnand %p467_p13, %p461_p10 }
  0x20   :  { %471 = shalt.err (!%p468_p0)
}
  0x21   :  { %48 = dma.hbm_to_vmem [thread:$0]  %s557_s3, 1024, %s43_s28, [#allocation6], %s499_s21, %s499_s21, %s500_s22  }
  0x22   :  { %492 = dma.done.wait [#allocation3], 64  }
  0x23   :  { %493 = vsyncadd [#allocation3], 4294967232 }
  0x24   :  { %494 = dma.done.wait [#allocation6], 2048  }
  0x25   :  { %495 = vsyncadd [#allocation6], 4294965248  ;;  %v503_v0 = vmov 0.0   ;;  %vm504_vm0 = vmmov 0   ;;  %v392_v1 = vld [vmem:[#allocation5 + $0x38] sm:$0xff]   ;;  %v393_v2 = vld [vmem:[#allocation5 + $0x30] sm:$0xff]   ;;  %v171_v18 = vlaneseq }
  0x26   :  { %344 = vmatprep.subr.bf16.mxu0 %v503_v0  ;;  %360 = vmatprep.mubr.msk.bf16.mxu0 %vm504_vm0, %v503_v0  ;;  %v394_v3 = vld [vmem:[#allocation5 + $0x28] sm:$0xff]   ;;  %v400_v4 = vld [vmem:[#allocation7 + $0x38] sm:$0xff]   ;;  %v395_v5 = vld [vmem:[#allocation5 + $0x20] sm:$0xff]  }
  0x27   :  { %364 = vmatprep.subr.bf16.mxu1 %v503_v0  ;;  %380 = vmatprep.mubr.msk.bf16.mxu1 %vm504_vm0, %v503_v0  ;;  %v401_v6 = vld [vmem:[#allocation7 + $0x30] sm:$0xff]   ;;  %v396_v7 = vld [vmem:[#allocation5 + $0x18] sm:$0xff]   ;;  %v402_v8 = vld [vmem:[#allocation7 + $0x28] sm:$0xff]   ;;  %v172_v19 = vshrl.u32 %v171_v18, 7 }
  0x28   :  { %345 = vmatpush3.bf16.msra.mxu0 %v392_v1  ;;  %365 = vmatpush3.bf16.msra.mxu1 %v400_v4  ;;  %v397_v9 = vld [vmem:[#allocation5 + $0x10] sm:$0xff]   ;;  %v398_v10 = vld [vmem:[#allocation5 + $0x8] sm:$0xff]   ;;  %v399_v11 = vld [vmem:[#allocation5] sm:$0xff]  }
  0x29   :  { %346 = vmatprep.subr.bf16.mxu0 %v503_v0  ;;  %366 = vmatprep.subr.bf16.mxu1 %v503_v0  ;;  %v61_v12 = vld [vmem:[#allocation2] sm:$0xf]  ;;  %v403_v13 = vld [vmem:[#allocation7 + $0x20] sm:$0xff]   ;;  %v405_v15 = vld [vmem:[#allocation7 + $0x10] sm:$0xff]   ;;  %v173_v22 = vsub.s32 0, %v172_v19 }
  0x2a   :  { %v404_v14 = vld [vmem:[#allocation7 + $0x18] sm:$0xff]   ;;  %v406_v16 = vld [vmem:[#allocation7 + $0x8] sm:$0xff]   ;;  %v407_v17 = vld [vmem:[#allocation7] sm:$0xff]  }
  0x2b   :  { %v167_v20 = vld [vmem:[%s556_s2] sm:$0x1]  ;;  %s505_s2 = smov [#allocation8]  }
  0x2c   :  { %347 = vmatpush3.bf16.msra.mxu0 %v393_v2  ;;  %367 = vmatpush3.bf16.msra.mxu1 %v401_v6  ;;  %v169_v21 = vpack.i.b16 %v167_v20, %v167_v20  ;;  %v282_v31 = vld [vmem:[%s558_s4] sm:$0x1]  ;;  %s300_s11 = sshll.u32 %s505_s2, 4  ;;  %s301_s11 = int_to_ptr.vmem [resolvable:$true] %s300_s11 }
  0x2d   :  { %348 = vmatprep.subr.bf16.mxu0 %v503_v0  ;;  %368 = vmatprep.subr.bf16.mxu1 %v503_v0  ;;  %v284_v32 = vpack.i.b16 %v282_v31, %v282_v31  ;;  %s472_s12 = scalar_lea.vmem %s301_s11, 128  ;;  %p477_p2 = scmp.lt.s32.totalorder %s301_s11, %s301_s11 }
  0x2e   :  { %v174_v23 = vrot.slane %v169_v21, %v173_v22  ;;  %p473_p1 = scmp.ne.s32.totalorder %s301_s11, %s472_s12  ;;  %p478_p3 = scmp.lt.s32.totalorder %s472_s12, %s472_s12 }
  0x2f   :  { %v289_v33 = vrot.slane %v284_v32, %v173_v22 }
  0x30   :  { %349 = vmatpush3.bf16.msra.mxu0 %v394_v3  ;;  %369 = vmatpush3.bf16.msra.mxu1 %v402_v8  ;;  %p479_p4 = por %p478_p3, %p477_p2 }
  0x31   :  { %350 = vmatprep.subr.bf16.mxu0 %v503_v0  ;;  %370 = vmatprep.subr.bf16.mxu1 %v503_v0 }
  0x32   :  { %p480_p5 = pnand %p479_p4, %p473_p1 }
  0x34   :  { %351 = vmatpush3.bf16.msra.mxu0 %v395_v5  ;;  %371 = vmatpush3.bf16.msra.mxu1 %v403_v13 }
  0x35   :  { %352 = vmatprep.subr.bf16.mxu0 %v503_v0  ;;  %372 = vmatprep.subr.bf16.mxu1 %v503_v0 }
  0x38   :  { %353 = vmatpush3.bf16.msra.mxu0 %v396_v7  ;;  %373 = vmatpush3.bf16.msra.mxu1 %v404_v14 }
  0x39   :  { %354 = vmatprep.subr.bf16.mxu0 %v503_v0  ;;  %374 = vmatprep.subr.bf16.mxu1 %v503_v0 }
  0x3c   :  { %355 = vmatpush3.bf16.msra.mxu0 %v397_v9  ;;  %375 = vmatpush3.bf16.msra.mxu1 %v405_v15 }
  0x3d   :  { %356 = vmatprep.subr.bf16.mxu0 %v503_v0  ;;  %376 = vmatprep.subr.bf16.mxu1 %v503_v0 }
  0x40   :  { %357 = vmatpush3.bf16.msra.mxu0 %v398_v10  ;;  %377 = vmatpush3.bf16.msra.mxu1 %v406_v16 }
  0x41   :  { %358 = vmatprep.subr.bf16.mxu0 %v503_v0  ;;  %378 = vmatprep.subr.bf16.mxu1 %v503_v0 }
  0x44   :  { %359 = vmatpush3.bf16.msra.mxu0 %v399_v11  ;;  %379 = vmatpush3.bf16.msra.mxu1 %v407_v17 }
  0x47   :  { %361 = vmatmul.mubr.bf16.vlgmr.msra.gmra.mxu0 %v61_v12 }
 0x107   :  { %v160_v24 = vpop.f32.mrf.mxu0 }
 0x108   :  { %v166_v25 = vpack.c.bf16 %v160_v24, %v160_v24 }
 0x109   :  { %v362_v26 = vpop.f32.mrf.mxu0 }
 0x10a   :  { %v175_v27 = vadd.bf16 %v174_v23, %v166_v25 }
 0x10b   :  { %v163_v28 = vpop.f32.mrf.mxu0 }
 0x10c   :  { %408 = vtanh.bf16 %v175_v27 }
 0x10d   :  { %v363_v29 = vpop.f32.mrf.mxu0 }
 0x11a   :  { %v409_v30 = vpop.eup %408 }
 0x11b   :  { %381 = vmatmul.mubr.bf16.vlgmr.msra.gmra.mxu1 %v409_v30 }
 0x1db   :  { %v275_v34 = vpop.f32.mrf.mxu1 }
 0x1dc   :  { %v281_v35 = vpack.c.bf16 %v275_v34, %v275_v34 }
 0x1dd   :  { %v382_v36 = vpop.f32.mrf.mxu1 }
 0x1de   :  { %v290_v37 = vadd.bf16 %v289_v33, %v281_v35 }
 0x1df   :  { %v278_v38 = vpop.f32.mrf.mxu1 }
 0x1e0   :  { %410 = vtanh.bf16 %v290_v37 }
 0x1e1   :  { %v383_v39 = vpop.f32.mrf.mxu1 }
 0x1ee   :  { %v411_v40 = vpop.eup %410 }
 0x1ef   :  { %v292_v41 = vunpack.c.l.bf16 %v411_v40 }
 0x1f1   :  { %293 = vst [vmem:[#allocation8] sm:$0xff] %v292_v41 }
 0x1f2   :  { %483 = shalt.err (!%p480_p5)
}
 0x1f3   :  { %303 = dma.vmem_to_hbm [thread:$0]  %s301_s11, 128, %s559_s5, [#allocation4]  }
 0x1f4   :  { %496 = dma.done.wait [#allocation4], 128  }
 0x1f5   :  { %497 = vsyncadd [#allocation4], 4294967168 }
 0x1f6   :  { %307 = vsyncpa [#allocation3], 1 }
 0x1f7   :  { %308 = vsyncpa [#allocation6], 1 }
 0x1f8   :  { %309 = vsyncpa [#allocation4], 1 }

// kernel: tpu_custom_call.1
= control target key start
LH: loop header
LB: loop body
LE: loop exit
PB: predicated region body
PF: predicated region fallthrough
CT: control target
= control target key end

     0   :  { %10 = vsyncpa [#allocation3], 0  ;;  %s554_s0 = inlined_call_operand.hbm [shape: bf16[8,128], index: 0, kind: input, shape index: {}]   ;;  %s555_s1 = inlined_call_operand.hbm [shape: bf16[128,128], index: 1, kind: input, shape index: {}]   ;;  %s556_s2 = inlined_call_operand.vmem [shape: bf16[1,128], index: 2, kind: input, shape index: {}]   ;;  %s557_s3 = inlined_call_operand.hbm [shape: bf16[128,128], index: 3, kind: input, shape index: {}]   ;;  %s558_s4 = inlined_call_operand.vmem [shape: bf16[1,128], index: 4, kind: input, shape index: {}]   ;;  %s559_s5 = inlined_call_operand.hbm [shape: f32[8,128], index: 5, kind: output, shape index: {}]  }
   0x1   :  { %11 = vsyncpa [#allocation6], 0 }
   0x2   :  { %12 = vsyncpa [#allocation4], 0  ;;  %s498_s18 = smov [#allocation5]  }
   0x3   :  { %s28_s19 = sshll.u32 %s498_s18, 4  ;;  %s29_s19 = int_to_ptr.vmem [resolvable:$true] %s28_s19 }
   0x4   :  { %s420_s20 = scalar_lea.vmem %s29_s19, 1024  ;;  %p425_p1 = scmp.lt.s32.totalorder %s29_s19, %s29_s19 }
   0x5   :  { %p421_p0 = scmp.ne.s32.totalorder %s29_s19, %s420_s20  ;;  %p426_p2 = scmp.lt.s32.totalorder %s420_s20, %s420_s20 }
   0x7   :  { %p427_p3 = por %p426_p2, %p425_p1 }
   0x9   :  { %p428_p4 = pnand %p427_p3, %p421_p0 }
   0xb   :  { %431 = shalt.err (!%p428_p4)
}
   0xc   :  { %s499_s21 = smov 64   ;;  %s500_s22 = smov 4  }
   0xd   :  { %34 = dma.hbm_to_vmem [thread:$0]  %s555_s1, 1024, %s29_s19, [#allocation6], %s499_s21, %s499_s21, %s500_s22  }
   0xe   :  { %s501_s25 = smov [#allocation2]   ;;  %s502_s27 = smov [#allocation7]  }
   0xf   :  { %s19_s26 = sshll.u32 %s501_s25, 4  ;;  %s42_s28 = sshll.u32 %s502_s27, 4  ;;  %s20_s26 = int_to_ptr.vmem [resolvable:$true] %s19_s26  ;;  %s43_s28 = int_to_ptr.vmem [resolvable:$true] %s42_s28 }
  0x10   :  { %s440_s29 = scalar_lea.vmem %s20_s26, 64  ;;  %p445_p6 = scmp.lt.s32.totalorder %s20_s26, %s20_s26 }
  0x11   :  { %p441_p5 = scmp.ne.s32.totalorder %s20_s26, %s440_s29  ;;  %p446_p7 = scmp.lt.s32.totalorder %s440_s29, %s440_s29 }
  0x13   :  { %p447_p8 = por %p446_p7, %p445_p6 }
  0x15   :  { %p448_p9 = pnand %p447_p8, %p441_p5 }
  0x17   :  { %451 = shalt.err (!%p448_p9)
}
  0x18   :  { %22 = dma.hbm_to_vmem [thread:$0]  %s554_s0, 64, %s20_s26, [#allocation3]  }
  0x19   :  { %s460_s7 = scalar_lea.vmem %s43_s28, 1024  ;;  %p465_p11 = scmp.lt.s32.totalorder %s43_s28, %s43_s28 }
  0x1a   :  { %p461_p10 = scmp.ne.s32.totalorder %s43_s28, %s460_s7  ;;  %p466_p12 = scmp.lt.s32.totalorder %s460_s7, %s460_s7 }
  0x1c   :  { %p467_p13 = por %p466_p12, %p465_p11 }
  0x1e   :  { %p468_p0 = pnand %p467_p13, %p461_p10 }
  0x20   :  { %471 = shalt.err (!%p468_p0)
}
  0x21   :  { %48 = dma.hbm_to_vmem [thread:$0]  %s557_s3, 1024, %s43_s28, [#allocation6], %s499_s21, %s499_s21, %s500_s22  }
  0x22   :  { %492 = dma.done.wait [#allocation3], 64  }
  0x23   :  { %493 = vsyncadd [#allocation3], 4294967232 }
  0x24   :  { %494 = dma.done.wait [#allocation6], 2048  }
  0x25   :  { %495 = vsyncadd [#allocation6], 4294965248  ;;  %v503_v0 = vmov 0.0   ;;  %vm504_vm0 = vmmov 0   ;;  %v392_v1 = vld [vmem:[#allocation5 + $0x38] sm:$0xff]   ;;  %v393_v2 = vld [vmem:[#allocation5 + $0x30] sm:$0xff]   ;;  %v171_v18 = vlaneseq }
  0x26   :  { %344 = vmatprep.subr.bf16.mxu0 %v503_v0  ;;  %360 = vmatprep.mubr.msk.bf16.mxu0 %vm504_vm0, %v503_v0  ;;  %v394_v3 = vld [vmem:[#allocation5 + $0x28] sm:$0xff]   ;;  %v400_v4 = vld [vmem:[#allocation7 + $0x38] sm:$0xff]   ;;  %v395_v5 = vld [vmem:[#allocation5 + $0x20] sm:$0xff]  }
  0x27   :  { %364 = vmatprep.subr.bf16.mxu1 %v503_v0  ;;  %380 = vmatprep.mubr.msk.bf16.mxu1 %vm504_vm0, %v503_v0  ;;  %v401_v6 = vld [vmem:[#allocation7 + $0x30] sm:$0xff]   ;;  %v396_v7 = vld [vmem:[#allocation5 + $0x18] sm:$0xff]   ;;  %v402_v8 = vld [vmem:[#allocation7 + $0x28] sm:$0xff]   ;;  %v172_v19 = vshrl.u32 %v171_v18, 7 }
  0x28   :  { %345 = vmatpush3.bf16.msra.mxu0 %v392_v1  ;;  %365 = vmatpush3.bf16.msra.mxu1 %v400_v4  ;;  %v397_v9 = vld [vmem:[#allocation5 + $0x10] sm:$0xff]   ;;  %v398_v10 = vld [vmem:[#allocation5 + $0x8] sm:$0xff]   ;;  %v399_v11 = vld [vmem:[#allocation5] sm:$0xff]  }
  0x29   :  { %346 = vmatprep.subr.bf16.mxu0 %v503_v0  ;;  %366 = vmatprep.subr.bf16.mxu1 %v503_v0  ;;  %v61_v12 = vld [vmem:[#allocation2] sm:$0xf]  ;;  %v403_v13 = vld [vmem:[#allocation7 + $0x20] sm:$0xff]   ;;  %v405_v15 = vld [vmem:[#allocation7 + $0x10] sm:$0xff]   ;;  %v173_v22 = vsub.s32 0, %v172_v19 }
  0x2a   :  { %v404_v14 = vld [vmem:[#allocation7 + $0x18] sm:$0xff]   ;;  %v406_v16 = vld [vmem:[#allocation7 + $0x8] sm:$0xff]   ;;  %v407_v17 = vld [vmem:[#allocation7] sm:$0xff]  }
  0x2b   :  { %v167_v20 = vld [vmem:[%s556_s2] sm:$0x1]  ;;  %s505_s2 = smov [#allocation8]  }
  0x2c   :  { %347 = vmatpush3.bf16.msra.mxu0 %v393_v2  ;;  %367 = vmatpush3.bf16.msra.mxu1 %v401_v6  ;;  %v169_v21 = vpack.i.b16 %v167_v20, %v167_v20  ;;  %v282_v31 = vld [vmem:[%s558_s4] sm:$0x1]  ;;  %s300_s11 = sshll.u32 %s505_s2, 4  ;;  %s301_s11 = int_to_ptr.vmem [resolvable:$true] %s300_s11 }
  0x2d   :  { %348 = vmatprep.subr.bf16.mxu0 %v503_v0  ;;  %368 = vmatprep.subr.bf16.mxu1 %v503_v0  ;;  %v284_v32 = vpack.i.b16 %v282_v31, %v282_v31  ;;  %s472_s12 = scalar_lea.vmem %s301_s11, 128  ;;  %p477_p2 = scmp.lt.s32.totalorder %s301_s11, %s301_s11 }
  0x2e   :  { %v174_v23 = vrot.slane %v169_v21, %v173_v22  ;;  %p473_p1 = scmp.ne.s32.totalorder %s301_s11, %s472_s12  ;;  %p478_p3 = scmp.lt.s32.totalorder %s472_s12, %s472_s12 }
  0x2f   :  { %v289_v33 = vrot.slane %v284_v32, %v173_v22 }
  0x30   :  { %349 = vmatpush3.bf16.msra.mxu0 %v394_v3  ;;  %369 = vmatpush3.bf16.msra.mxu1 %v402_v8  ;;  %p479_p4 = por %p478_p3, %p477_p2 }
  0x31   :  { %350 = vmatprep.subr.bf16.mxu0 %v503_v0  ;;  %370 = vmatprep.subr.bf16.mxu1 %v503_v0 }
  0x32   :  { %p480_p5 = pnand %p479_p4, %p473_p1 }
  0x34   :  { %351 = vmatpush3.bf16.msra.mxu0 %v395_v5  ;;  %371 = vmatpush3.bf16.msra.mxu1 %v403_v13 }
  0x35   :  { %352 = vmatprep.subr.bf16.mxu0 %v503_v0  ;;  %372 = vmatprep.subr.bf16.mxu1 %v503_v0 }
  0x38   :  { %353 = vmatpush3.bf16.msra.mxu0 %v396_v7  ;;  %373 = vmatpush3.bf16.msra.mxu1 %v404_v14 }
  0x39   :  { %354 = vmatprep.subr.bf16.mxu0 %v503_v0  ;;  %374 = vmatprep.subr.bf16.mxu1 %v503_v0 }
  0x3c   :  { %355 = vmatpush3.bf16.msra.mxu0 %v397_v9  ;;  %375 = vmatpush3.bf16.msra.mxu1 %v405_v15 }
  0x3d   :  { %356 = vmatprep.subr.bf16.mxu0 %v503_v0  ;;  %376 = vmatprep.subr.bf16.mxu1 %v503_v0 }
  0x40   :  { %357 = vmatpush3.bf16.msra.mxu0 %v398_v10  ;;  %377 = vmatpush3.bf16.msra.mxu1 %v406_v16 }
  0x41   :  { %358 = vmatprep.subr.bf16.mxu0 %v503_v0  ;;  %378 = vmatprep.subr.bf16.mxu1 %v503_v0 }
  0x44   :  { %359 = vmatpush3.bf16.msra.mxu0 %v399_v11  ;;  %379 = vmatpush3.bf16.msra.mxu1 %v407_v17 }
  0x47   :  { %361 = vmatmul.mubr.bf16.vlgmr.msra.gmra.mxu0 %v61_v12 }
 0x107   :  { %v160_v24 = vpop.f32.mrf.mxu0 }
 0x108   :  { %v166_v25 = vpack.c.bf16 %v160_v24, %v160_v24 }
 0x109   :  { %v362_v26 = vpop.f32.mrf.mxu0 }
 0x10a   :  { %v175_v27 = vadd.bf16 %v174_v23, %v166_v25 }
 0x10b   :  { %v163_v28 = vpop.f32.mrf.mxu0 }
 0x10c   :  { %408 = vtanh.bf16 %v175_v27 }
 0x10d   :  { %v363_v29 = vpop.f32.mrf.mxu0 }
 0x11a   :  { %v409_v30 = vpop.eup %408 }
 0x11b   :  { %381 = vmatmul.mubr.bf16.vlgmr.msra.gmra.mxu1 %v409_v30 }
 0x1db   :  { %v275_v34 = vpop.f32.mrf.mxu1 }
 0x1dc   :  { %v281_v35 = vpack.c.bf16 %v275_v34, %v275_v34 }
 0x1dd   :  { %v382_v36 = vpop.f32.mrf.mxu1 }
 0x1de   :  { %v290_v37 = vadd.bf16 %v289_v33, %v281_v35 }
 0x1df   :  { %v278_v38 = vpop.f32.mrf.mxu1 }
 0x1e0   :  { %410 = vtanh.bf16 %v290_v37 }
 0x1e1   :  { %v383_v39 = vpop.f32.mrf.mxu1 }
 0x1ee   :  { %v411_v40 = vpop.eup %410 }
 0x1ef   :  { %v292_v41 = vunpack.c.l.bf16 %v411_v40 }
 0x1f1   :  { %293 = vst [vmem:[#allocation8] sm:$0xff] %v292_v41 }
 0x1f2   :  { %483 = shalt.err (!%p480_p5)
}
 0x1f3   :  { %303 = dma.vmem_to_hbm [thread:$0]  %s301_s11, 128, %s559_s5, [#allocation4]  }
 0x1f4   :  { %496 = dma.done.wait [#allocation4], 128  }
 0x1f5   :  { %497 = vsyncadd [#allocation4], 4294967168 }
 0x1f6   :  { %307 = vsyncpa [#allocation3], 1 }
 0x1f7   :  { %308 = vsyncpa [#allocation6], 1 }
 0x1f8   :  { %309 = vsyncpa [#allocation4], 1 }

</bundles_post_ra>
